<compile_context>
chip_gen: v7x
topology: tpu7x:2x2x1
jax: 0.10.0
libtpu: 0.0.40
codegen_flags: <defaults>
</compile_context>

<pallas_src>
import jax
import jax.numpy as jnp
from jax.experimental import pallas as pl
from jax.experimental.pallas import tpu as pltpu


def _taylor_kernel(x_ref, o_ref):
    # Pass 1: row denominator.  `num` is recomputed in pass 2 instead of being
    # kept live across the lane reduction (smaller per-step VMEM footprint).
    x = x_ref[...].astype(jnp.float32)
    denom = jnp.sum(1.0 + x + 0.5 * x * x, axis=1, keepdims=True)   # (tb, 1)
    inv = pl.reciprocal(denom, approx=False)                        # exact, tiny column
    # Pass 2: recompute num and emit log(num/denom + eps) in the output dtype.
    x2 = x_ref[...].astype(jnp.float32)
    num = 1.0 + x2 + 0.5 * x2 * x2                                  # >= 0.5 > 0
    o_ref[...] = jnp.log(num * inv + 1e-12).astype(o_ref.dtype)


def _round_down(v, m):
    return (v // m) * m


def _round_up(v, m):
    return ((v + m - 1) // m) * m


def _vmem_limit_bytes():
    """~70% of physical VMEM, capped at 90 MiB (v5e/v6e: 128 MiB, v7x: 64 MiB/TC)."""
    try:
        cap = int(pltpu.get_tpu_info().vmem_capacity_bytes)
    except Exception:
        cap = 64 << 20  # conservative fallback (v7x per-TC)
    return min((cap * 7) // 10, 90 << 20)


def _derive_batch_tile(B, C, in_bytes, out_bytes, block_b, vmem_limit):
    """Batch tile: VMEM-budgeted, (8,128)-aligned, >= ~4 balanced grid steps."""
    mult = 16 if min(in_bytes, out_bytes) < 4 else 8
    # Per-row VMEM of one grid step: double-buffered in + out blocks plus
    # up to two f32 polynomial temps (+8 B/elem).  Leave 10% headroom.
    budget = (vmem_limit * 9) // 10
    row_bytes = C * (2 * in_bytes + 2 * out_bytes + 8)
    tb_vmem = max(mult, budget // row_bytes)
    # Prefer ~4 balanced grid steps when blocks stay >= ~1 MiB so the DMA
    # pipeline overlaps and v7x megacore gets a balanced split; per-step
    # overhead (~0.35 us) stays amortized.
    rows_1mb = max(mult, _round_up((1 << 20) // max(1, C * (in_bytes + out_bytes)), mult))
    balanced = _round_up(max(1, pl.cdiv(B, 4)), mult)
    tb = min(block_b, B, tb_vmem, max(balanced, rows_1mb))
    if tb < B:
        tb = max(mult, _round_down(tb, mult))   # (8,128) rule: second-minor dim % 8 == 0
        tb = min(tb, B)                         # == B is also legal (full-dim block)
    else:
        tb = B
    return tb


def taylor(x, *, block_b=1024):
    """Pallas implementation of Taylor.forward for 2-D input (B, C)."""
    B, C = x.shape
    out_dtype = x.dtype
    in_bytes = x.dtype.itemsize
    out_bytes = jnp.dtype(out_dtype).itemsize

    vmem_limit = _vmem_limit_bytes()
    tb = _derive_batch_tile(B, C, in_bytes, out_bytes, block_b, vmem_limit)
    grid = (pl.cdiv(B, tb),)

    cost = pl.CostEstimate(
        flops=6 * B * C,                               # poly + sum + mul + eps-add
        transcendentals=B * C,                         # one log per element
        bytes_accessed=B * C * (in_bytes + out_bytes),
    )

    return pl.pallas_call(
        _taylor_kernel,
        out_shape=jax.ShapeDtypeStruct((B, C), out_dtype),
        grid=grid,
        in_specs=[pl.BlockSpec((tb, C), lambda i: (i, 0))],
        out_specs=pl.BlockSpec((tb, C), lambda i: (i, 0)),
        compiler_params=pltpu.CompilerParams(
            dimension_semantics=("parallel",),
            vmem_limit_bytes=vmem_limit,
        ),
        cost_estimate=cost,
    )(x)


def _taylor_ref(x):
    """Plain-JAX reference mirroring the PyTorch forward."""
    x = x.astype(jnp.float32)
    num = 1.0 + x + 0.5 * x ** 2
    den = jnp.sum(num, axis=1, keepdims=True)
    return jnp.log(num / den + 1e-12)


if __name__ == "__main__":
    key = jax.random.PRNGKey(0)
    k1, k2, k3 = jax.random.split(key, 3)

    # Case 1: lane-friendly shape (B=8, C=128), float32, single-step grid.
    x1 = jax.random.normal(k1, (8, 128), dtype=jnp.float32)
    out1 = jax.block_until_ready(taylor(x1))
    ref1 = _taylor_ref(x1)
    assert out1.shape == ref1.shape
    assert jnp.max(jnp.abs(out1 - ref1)) < 1e-5, float(jnp.max(jnp.abs(out1 - ref1)))

    # Case 2: ragged batch (B=20 not divisible by the tile), small C=32,
    # user-capped block -> multi-step grid with a padded final block.
    x2 = jax.random.normal(k2, (20, 32), dtype=jnp.float32)
    out2 = jax.block_until_ready(taylor(x2, block_b=8))
    ref2 = _taylor_ref(x2)
    assert jnp.max(jnp.abs(out2 - ref2)) < 1e-5, float(jnp.max(jnp.abs(out2 - ref2)))

    # Case 3: medium batch exercising the derived multi-step tiling (default block_b).
    x3 = jax.random.normal(k3, (48, 256), dtype=jnp.float32)
    out3 = jax.block_until_ready(taylor(x3))
    ref3 = _taylor_ref(x3)
    assert jnp.max(jnp.abs(out3 - ref3)) < 1e-5, float(jnp.max(jnp.abs(out3 - ref3)))

    # Case 4: bf16 input stays bf16 end-to-end (no wrapper upcast); loose check.
    x4 = x1.astype(jnp.bfloat16)
    out4 = jax.block_until_ready(taylor(x4))
    assert out4.dtype == jnp.bfloat16
    assert jnp.max(jnp.abs(out4.astype(jnp.float32) - _taylor_ref(x4))) < 5e-2

    print("KERNEL_OK")
</pallas_src>

<mosaic_0001>
module attributes {stable_mosaic.version = 11 : i64} {
  func.func @_taylor_kernel(%arg0: i32, %arg1: memref<8x128xf32, #tpu.memory_space<vmem>>, %arg2: memref<8x128xf32, #tpu.memory_space<vmem>>) attributes {dimension_semantics = [#tpu.dimension_semantics<parallel>], iteration_bounds = array<i64: 1>, scalar_prefetch = 0 : i64, scratch_operands = 0 : i64, tpu.core_type = #tpu.core_type<tc>, window_params = [{transform_indices = @transform_0, window_bounds = array<i64: 8, 128>}, {transform_indices = @transform_1, window_bounds = array<i64: 8, 128>}]} {
    %c0 = arith.constant 0 : index
    %c0_0 = arith.constant 0 : index
    %0 = vector.load %arg1[%c0, %c0_0] : memref<8x128xf32, #tpu.memory_space<vmem>>, vector<8x128xf32>
    %cst = arith.constant 1.000000e+00 : f32
    %1 = vector.broadcast %cst : f32 to vector<8x128xf32>
    %2 = arith.addf %1, %0 : vector<8x128xf32>
    %cst_1 = arith.constant 5.000000e-01 : f32
    %3 = vector.broadcast %cst_1 : f32 to vector<8x128xf32>
    %4 = arith.mulf %3, %0 : vector<8x128xf32>
    %5 = arith.mulf %4, %0 : vector<8x128xf32>
    %6 = arith.addf %2, %5 : vector<8x128xf32>
    %cst_2 = arith.constant dense<0.000000e+00> : vector<8xf32>
    %7 = vector.multi_reduction <add>, %6, %cst_2 [1] : vector<8x128xf32> to vector<8xf32>
    %8 = vector.shape_cast %7 : vector<8xf32> to vector<8x1xf32>
    %9 = tpu.reciprocal %8 : vector<8x1xf32> -> vector<8x1xf32>
    %c0_3 = arith.constant 0 : index
    %c0_4 = arith.constant 0 : index
    %10 = vector.load %arg1[%c0_3, %c0_4] : memref<8x128xf32, #tpu.memory_space<vmem>>, vector<8x128xf32>
    %cst_5 = arith.constant 1.000000e+00 : f32
    %11 = vector.broadcast %cst_5 : f32 to vector<8x128xf32>
    %12 = arith.addf %11, %10 : vector<8x128xf32>
    %cst_6 = arith.constant 5.000000e-01 : f32
    %13 = vector.broadcast %cst_6 : f32 to vector<8x128xf32>
    %14 = arith.mulf %13, %10 : vector<8x128xf32>
    %15 = arith.mulf %14, %10 : vector<8x128xf32>
    %16 = arith.addf %12, %15 : vector<8x128xf32>
    %17 = vector.broadcast %9 : vector<8x1xf32> to vector<8x128xf32>
    %18 = arith.mulf %16, %17 : vector<8x128xf32>
    %cst_7 = arith.constant 9.99999996E-13 : f32
    %19 = vector.broadcast %cst_7 : f32 to vector<8x128xf32>
    %20 = arith.addf %18, %19 : vector<8x128xf32>
    %21 = math.log %20 : vector<8x128xf32>
    %c0_8 = arith.constant 0 : index
    %c0_9 = arith.constant 0 : index
    %22 = vector.load %arg2[%c0_8, %c0_9] : memref<8x128xf32, #tpu.memory_space<vmem>>, vector<8x128xf32>
    tpu.vector_store %arg2[%c0_8, %c0_9], %21 {strides = array<i32>} : memref<8x128xf32, #tpu.memory_space<vmem>>, vector<8x128xf32>,
    return
  }
  func.func @transform_0(%arg0: i32) -> (i32, i32) {
    %c0_i32 = arith.constant 0 : i32
    %c0_i32_0 = arith.constant 0 : i32
    return %arg0, %c0_i32 : i32, i32
  }
  func.func @transform_1(%arg0: i32) -> (i32, i32) {
    %c0_i32 = arith.constant 0 : i32
    %c0_i32_0 = arith.constant 0 : i32
    return %arg0, %c0_i32 : i32, i32
  }
}

</mosaic_0001>

<bundles_post_ra>
// kernel: tpu_custom_call.1
= control target key start
LH: loop header
LB: loop body
LE: loop exit
PB: predicated region body
PF: predicated region fallthrough
CT: control target
= control target key end

     0   :  { %6 = vsyncpa [#allocation3], 0  ;;  %s139_s0 = inlined_call_operand.hbm [shape: f32[8,128], index: 0, kind: input, shape index: {}]   ;;  %s140_s1 = inlined_call_operand.hbm [shape: f32[8,128], index: 1, kind: output, shape index: {}]  }
   0x1   :  { %7 = vsyncpa [#allocation4], 0  ;;  %s103_s6 = smov [#allocation2]   ;;  %s55_s10 = scalar_lea.hbm %s139_s0, 128 }
   0x2   :  { %s14_s7 = sshll.u32 %s103_s6, 4  ;;  %p56_p0 = scmp.ne.s32.totalorder %s139_s0, %s55_s10  ;;  %s15_s7 = int_to_ptr.vmem [resolvable:$true] %s14_s7 }
   0x3   :  { %p59_p1 = scmp.lt.u32.totalorder %s55_s10, %s139_s0 }
   0x5   :  { %p61_p2 = pnand %p59_p1, %p56_p0 }
   0x7   :  { %64 = shalt.err (!%p61_p2)
}
   0x8   :  { %s65_s15 = scalar_lea.vmem %s15_s7, 128  ;;  %p70_p4 = scmp.lt.s32.totalorder %s15_s7, %s15_s7 }
   0x9   :  { %p66_p3 = scmp.ne.s32.totalorder %s15_s7, %s65_s15  ;;  %p71_p5 = scmp.lt.s32.totalorder %s65_s15, %s65_s15 }
   0xb   :  { %p72_p6 = por %p71_p5, %p70_p4 }
   0xd   :  { %p73_p7 = pnand %p72_p6, %p66_p3 }
   0xf   :  { %76 = shalt.err (!%p73_p7)
}
  0x10   :  { %17 = dma.hbm_to_vmem [thread:$0]  %s139_s0, 128, %s15_s7, [#allocation3]  }
  0x11   :  { %99 = dma.done.wait [#allocation3], 128  }
  0x12   :  { %100 = vsyncadd [#allocation3], 4294967168  ;;  %v21_v0 = vld [vmem:[#allocation2] sm:$0xff]  ;;  %s104_s18 = smov [#allocation5]  }
  0x13   :  { %v22_v1 = vadd.f32 1.0, %v21_v0  ;;  %v23_v2 = vmul.f32 0.5, %v21_v0  ;;  %s40_s19 = sshll.u32 %s104_s18, 4  ;;  %s41_s19 = int_to_ptr.vmem [resolvable:$true] %s40_s19 }
  0x14   :  { %s77_s0 = scalar_lea.vmem %s41_s19, 128  ;;  %p82_p9 = scmp.lt.s32.totalorder %s41_s19, %s41_s19 }
  0x15   :  { %v24_v3 = vmul.f32 %v23_v2, %v21_v0  ;;  %p78_p8 = scmp.ne.s32.totalorder %s41_s19, %s77_s0  ;;  %p83_p10 = scmp.lt.s32.totalorder %s77_s0, %s77_s0 }
  0x17   :  { %v25_v4 = vadd.f32 %v24_v3, %v22_v1  ;;  %p84_p11 = por %p83_p10, %p82_p9 }
  0x19   :  { %26 = vadd.xlane.f32.xlu0 %v25_v4  ;;  %p85_p12 = pnand %p84_p11, %p78_p8 }
  0xa6   :  { %v27_v5 = vpop.xlane.xlu0 %26 }
  0xa7   :  { %51 = vrcp.f32 %v27_v5 }
  0xb1   :  { %v52_v6 = vpop.eup %51 }
  0xb2   :  { %v29_v7 = vmul.f32 %v52_v6, %v25_v4 }
  0xb4   :  { %v30_v8 = vadd.f32 1e-12, %v29_v7 }
  0xb6   :  { %53 = vlog2.f32 %v30_v8 }
  0xc0   :  { %v54_v9 = vpop.eup %53 }
  0xc1   :  { %v32_v10 = vmul.f32 0.6931472, %v54_v9 }
  0xc3   :  { %33 = vst [vmem:[#allocation5] sm:$0xff] %v32_v10 }
  0xc4   :  { %88 = shalt.err (!%p85_p12)
}
  0xc5   :  { %s89_s22 = scalar_lea.hbm %s140_s1, 128 }
  0xc6   :  { %p90_p13 = scmp.ne.s32.totalorder %s140_s1, %s89_s22  ;;  %p93_p0 = scmp.lt.u32.totalorder %s89_s22, %s140_s1 }
  0xc8   :  { %p95_p1 = pnand %p93_p0, %p90_p13 }
  0xca   :  { %98 = shalt.err (!%p95_p1)
}
  0xcb   :  { %43 = dma.vmem_to_hbm [thread:$0]  %s41_s19, 128, %s140_s1, [#allocation4]  }
  0xcc   :  { %101 = dma.done.wait [#allocation4], 128  }
  0xcd   :  { %102 = vsyncadd [#allocation4], 4294967168 }
  0xce   :  { %47 = vsyncpa [#allocation3], 1 }
  0xcf   :  { %48 = vsyncpa [#allocation4], 1 }

</bundles_post_ra>
